<compile_context>
chip_gen: v6e
topology: v6e:2x2x1
jax: 0.10.0
libtpu: 0.0.40
codegen_flags: <defaults>
</compile_context>

<pallas_src>
import jax
import jax.numpy as jnp
import numpy as np
from jax.experimental import pallas as pl
from jax.experimental.pallas import tpu as pltpu


def _mlp_kernel(x_ref, w1_ref, b1_ref, w2_ref, b2_ref, w3_ref, b3_ref, o_ref):
    # x_ref: [2, T] bf16, feature-major (batch on lanes). Whole MLP runs on one tile.
    x = x_ref[...]                       # [2, T]  bf16
    w1 = w1_ref[...]                     # [64, 2] bf16

    # Layer 1: K=2 -> VPU outer-product path (two broadcast mul/adds), skip the MXU.
    # Entire computation in bf16 so h1 is born bf16 (no separate cast pass, half the vregs).
    h1 = w1[:, 0:1] * x[0:1, :] + w1[:, 1:2] * x[1:2, :] + b1_ref[...]   # [64, T] bf16
    h1 = jnp.maximum(h1, 0)

    # Layer 2: [32,64]bf16 @ [64,T]bf16 on the MXU, f32 accumulation, f32 bias.
    h2 = jnp.dot(w2_ref[...], h1, preferred_element_type=jnp.float32) + b2_ref[...]
    h2 = jnp.maximum(h2, 0.0).astype(jnp.bfloat16)                        # [32, T] bf16

    # Layer 3: [2,32]bf16 @ [32,T]bf16 on the MXU, f32 accumulation, f32 bias.
    out = jnp.dot(w3_ref[...], h2, preferred_element_type=jnp.float32) + b3_ref[...]

    o_ref[...] = out.astype(o_ref.dtype)                                  # [2, T] f32


def _round_up(n, m):
    return -(-n // m) * m


def spcnet_forward(x, params, *, batch_tile=8192):
    """x: [B, 2] float32 (row-major, like the PyTorch module).

    params: dict with PyTorch-layout weights:
        w1 [64, 2], b1 [64, 1], w2 [32, 64], b2 [32, 1], w3 [2, 32], b3 [2, 1]
    Returns [B, 2] float32.
    """
    B, Din = x.shape
    assert Din == 2
    assert batch_tile % 128 == 0, "batch tile must be lane-aligned (multiple of 128)"

    # One-time (grid-invariant) casts outside the kernel.
    w1 = params["w1"].astype(jnp.bfloat16)
    b1 = params["b1"].astype(jnp.bfloat16)
    w2 = params["w2"].astype(jnp.bfloat16)
    b2 = params["b2"]                       # f32 [32, 1], added after f32 accumulation
    w3 = params["w3"].astype(jnp.bfloat16)
    b3 = params["b3"]                       # f32 [2, 1]
    Dout = w3.shape[0]

    # Tiling:
    #  * lane-align the batch,
    #  * clamp the tile so small batches don't run a mostly-padding tile,
    #  * when the batch supports >=2 tiles, split so v7x's 2nd TensorCore gets work.
    Br = _round_up(B, 128)
    tile = min(batch_tile, Br)
    if Br >= 2 * 128 and Br <= tile:
        tile = _round_up(-(-Br // 2), 128)
    num_tiles = pl.cdiv(Br, tile)
    Bp = num_tiles * tile

    # Feature-major, bf16 input: batch on the last (lane) axis; pad B to whole tiles.
    xt = x.T.astype(jnp.bfloat16)                  # [2, B]
    if Bp != B:
        xt = jnp.pad(xt, ((0, 0), (0, Bp - B)))    # [2, Bp]

    full = lambda i: (0, 0)                        # weights/biases: one resident block

    out_t = pl.pallas_call(
        _mlp_kernel,
        out_shape=jax.ShapeDtypeStruct((Dout, Bp), jnp.float32),
        grid_spec=pltpu.PrefetchScalarGridSpec(
            num_scalar_prefetch=0,
            grid=(num_tiles,),
            in_specs=[
                pl.BlockSpec((Din, tile), lambda i: (0, i)),
                pl.BlockSpec(w1.shape, full),
                pl.BlockSpec(b1.shape, full),
                pl.BlockSpec(w2.shape, full),
                pl.BlockSpec(b2.shape, full),
                pl.BlockSpec(w3.shape, full),
                pl.BlockSpec(b3.shape, full),
            ],
            out_specs=pl.BlockSpec((Dout, tile), lambda i: (0, i)),
        ),
        compiler_params=pltpu.CompilerParams(
            dimension_semantics=("parallel",),     # shards tiles across v7x's 2 TCs
        ),
    )(xt, w1, b1, w2, b2, w3, b3)

    return out_t[:, :B].T                          # back to row-major [B, 2]


def init_params(key):
    """Deterministic init mimicking PyTorch nn.Linear default
    (U[-1/sqrt(fan_in), 1/sqrt(fan_in)]). Weights stored PyTorch-style [out, in],
    biases [out, 1]."""
    dims = [(2, 64), (64, 32), (32, 2)]            # (in, out) per layer
    keys = jax.random.split(key, 2 * len(dims))
    params = {}
    for idx, (din, dout) in enumerate(dims):
        bound = 1.0 / np.sqrt(din)
        w = jax.random.uniform(keys[2 * idx], (dout, din), jnp.float32, -bound, bound)
        b = jax.random.uniform(keys[2 * idx + 1], (dout, 1), jnp.float32, -bound, bound)
        params[f"w{idx + 1}"] = w
        params[f"b{idx + 1}"] = b
    return params


def spcnet_reference(x, params):
    """Pure-JAX f32 reference matching the PyTorch forward."""
    h1 = jnp.maximum(x @ params["w1"].T + params["b1"][:, 0], 0.0)
    h2 = jnp.maximum(h1 @ params["w2"].T + params["b2"][:, 0], 0.0)
    return h2 @ params["w3"].T + params["b3"][:, 0]


if __name__ == "__main__":
    key = jax.random.PRNGKey(0)
    k_params, k_x = jax.random.split(key)
    params = init_params(k_params)

    batch = 16                                     # small demo batch; wrapper clamps the tile
    x = jax.random.normal(k_x, (batch, 2), jnp.float32)

    out = spcnet_forward(x, params)
    out = jax.block_until_ready(out)

    ref = spcnet_reference(x, params)
    # Layer 1 runs on the VPU in bf16 and layers 2/3 run the MXU in bf16 (f32 accumulation),
    # so tolerance is relaxed vs the pure-f32 PyTorch reference.
    np.testing.assert_allclose(np.asarray(out), np.asarray(ref), rtol=3e-2, atol=3e-2)

    print("KERNEL_OK")
</pallas_src>

<mosaic_0001>
module attributes {stable_mosaic.version = 11 : i64} {
  func.func @_mlp_kernel(%arg0: i32, %arg1: memref<2x128xbf16, #tpu.memory_space<vmem>>, %arg2: memref<64x2xbf16, #tpu.memory_space<vmem>>, %arg3: memref<64x1xbf16, #tpu.memory_space<vmem>>, %arg4: memref<32x64xbf16, #tpu.memory_space<vmem>>, %arg5: memref<32x1xf32, #tpu.memory_space<vmem>>, %arg6: memref<2x32xbf16, #tpu.memory_space<vmem>>, %arg7: memref<2x1xf32, #tpu.memory_space<vmem>>, %arg8: memref<2x128xf32, #tpu.memory_space<vmem>>) attributes {dimension_semantics = [#tpu.dimension_semantics<parallel>], iteration_bounds = array<i64: 1>, scalar_prefetch = 0 : i64, scratch_operands = 0 : i64, tpu.core_type = #tpu.core_type<tc>, window_params = [{transform_indices = @transform_0, window_bounds = array<i64: 2, 128>}, {pipeline_mode = #tpu.pipeline_mode<synchronous>, transform_indices = @transform_1, window_bounds = array<i64: 64, 2>}, {pipeline_mode = #tpu.pipeline_mode<synchronous>, transform_indices = @transform_2, window_bounds = array<i64: 64, 1>}, {pipeline_mode = #tpu.pipeline_mode<synchronous>, transform_indices = @transform_3, window_bounds = array<i64: 32, 64>}, {pipeline_mode = #tpu.pipeline_mode<synchronous>, transform_indices = @transform_4, window_bounds = array<i64: 32, 1>}, {pipeline_mode = #tpu.pipeline_mode<synchronous>, transform_indices = @transform_5, window_bounds = array<i64: 2, 32>}, {pipeline_mode = #tpu.pipeline_mode<synchronous>, transform_indices = @transform_6, window_bounds = array<i64: 2, 1>}, {transform_indices = @transform_7, window_bounds = array<i64: 2, 128>}]} {
    %c0 = arith.constant 0 : index
    %c0_0 = arith.constant 0 : index
    %0 = vector.load %arg1[%c0, %c0_0] : memref<2x128xbf16, #tpu.memory_space<vmem>>, vector<2x128xbf16>
    %c0_1 = arith.constant 0 : index
    %c0_2 = arith.constant 0 : index
    %1 = vector.load %arg2[%c0_1, %c0_2] : memref<64x2xbf16, #tpu.memory_space<vmem>>, vector<64x2xbf16>
    %2 = vector.extract_strided_slice %1 {offsets = [0, 0], sizes = [64, 1], strides = [1, 1]} : vector<64x2xbf16> to vector<64x1xbf16>
    %3 = vector.extract_strided_slice %0 {offsets = [0, 0], sizes = [1, 128], strides = [1, 1]} : vector<2x128xbf16> to vector<1x128xbf16>
    %4 = vector.broadcast %2 : vector<64x1xbf16> to vector<64x128xbf16>
    %5 = vector.broadcast %3 : vector<1x128xbf16> to vector<64x128xbf16>
    %6 = arith.mulf %4, %5 : vector<64x128xbf16>
    %7 = vector.extract_strided_slice %1 {offsets = [0, 1], sizes = [64, 1], strides = [1, 1]} : vector<64x2xbf16> to vector<64x1xbf16>
    %8 = vector.extract_strided_slice %0 {offsets = [1, 0], sizes = [1, 128], strides = [1, 1]} : vector<2x128xbf16> to vector<1x128xbf16>
    %9 = vector.broadcast %7 : vector<64x1xbf16> to vector<64x128xbf16>
    %10 = vector.broadcast %8 : vector<1x128xbf16> to vector<64x128xbf16>
    %11 = arith.mulf %9, %10 : vector<64x128xbf16>
    %12 = arith.addf %6, %11 : vector<64x128xbf16>
    %c0_3 = arith.constant 0 : index
    %c0_4 = arith.constant 0 : index
    %13 = vector.load %arg3[%c0_3, %c0_4] : memref<64x1xbf16, #tpu.memory_space<vmem>>, vector<64x1xbf16>
    %14 = vector.broadcast %13 : vector<64x1xbf16> to vector<64x128xbf16>
    %15 = arith.addf %12, %14 : vector<64x128xbf16>
    %cst = arith.constant 0.000000e+00 : bf16
    %16 = vector.broadcast %cst : bf16 to vector<64x128xbf16>
    %17 = arith.maximumf %15, %16 : vector<64x128xbf16>
    %c0_5 = arith.constant 0 : index
    %c0_6 = arith.constant 0 : index
    %18 = vector.load %arg4[%c0_5, %c0_6] : memref<32x64xbf16, #tpu.memory_space<vmem>>, vector<32x64xbf16>
    %cst_7 = arith.constant dense<0.000000e+00> : vector<32x128xf32>
    %19 = tpu.matmul %18, %17, %cst_7 {dimension_numbers = #tpu.dot_dimension_numbers<[1], [0], [0], [1], [0, 0, 1, 1], [], []>} : vector<32x64xbf16>, vector<64x128xbf16>, vector<32x128xf32> -> vector<32x128xf32>
    %c0_8 = arith.constant 0 : index
    %c0_9 = arith.constant 0 : index
    %20 = vector.load %arg5[%c0_8, %c0_9] : memref<32x1xf32, #tpu.memory_space<vmem>>, vector<32x1xf32>
    %21 = vector.broadcast %20 : vector<32x1xf32> to vector<32x128xf32>
    %22 = arith.addf %19, %21 : vector<32x128xf32>
    %cst_10 = arith.constant 0.000000e+00 : f32
    %23 = vector.broadcast %cst_10 : f32 to vector<32x128xf32>
    %24 = arith.maximumf %22, %23 : vector<32x128xf32>
    %25 = arith.truncf %24 : vector<32x128xf32> to vector<32x128xbf16>
    %c0_11 = arith.constant 0 : index
    %c0_12 = arith.constant 0 : index
    %26 = vector.load %arg6[%c0_11, %c0_12] : memref<2x32xbf16, #tpu.memory_space<vmem>>, vector<2x32xbf16>
    %cst_13 = arith.constant dense<0.000000e+00> : vector<2x128xf32>
    %27 = tpu.matmul %26, %25, %cst_13 {dimension_numbers = #tpu.dot_dimension_numbers<[1], [0], [0], [1], [0, 0, 1, 1], [], []>} : vector<2x32xbf16>, vector<32x128xbf16>, vector<2x128xf32> -> vector<2x128xf32>
    %c0_14 = arith.constant 0 : index
    %c0_15 = arith.constant 0 : index
    %28 = vector.load %arg7[%c0_14, %c0_15] : memref<2x1xf32, #tpu.memory_space<vmem>>, vector<2x1xf32>
    %29 = vector.broadcast %28 : vector<2x1xf32> to vector<2x128xf32>
    %30 = arith.addf %27, %29 : vector<2x128xf32>
    %c0_16 = arith.constant 0 : index
    %c0_17 = arith.constant 0 : index
    %31 = vector.load %arg8[%c0_16, %c0_17] : memref<2x128xf32, #tpu.memory_space<vmem>>, vector<2x128xf32>
    tpu.vector_store %arg8[%c0_16, %c0_17], %30 {strides = array<i32>} : memref<2x128xf32, #tpu.memory_space<vmem>>, vector<2x128xf32>,
    return
  }
  func.func @transform_0(%arg0: i32) -> (i32, i32) {
    %c0_i32 = arith.constant 0 : i32
    %c0_i32_0 = arith.constant 0 : i32
    return %c0_i32, %arg0 : i32, i32
  }
  func.func @transform_1(%arg0: i32) -> (i32, i32) {
    %c0_i32 = arith.constant 0 : i32
    %c0_i32_0 = arith.constant 0 : i32
    %c0_i32_1 = arith.constant 0 : i32
    return %c0_i32, %c0_i32_0 : i32, i32
  }
  func.func @transform_2(%arg0: i32) -> (i32, i32) {
    %c0_i32 = arith.constant 0 : i32
    %c0_i32_0 = arith.constant 0 : i32
    %c0_i32_1 = arith.constant 0 : i32
    return %c0_i32, %c0_i32_0 : i32, i32
  }
  func.func @transform_3(%arg0: i32) -> (i32, i32) {
    %c0_i32 = arith.constant 0 : i32
    %c0_i32_0 = arith.constant 0 : i32
    %c0_i32_1 = arith.constant 0 : i32
    return %c0_i32, %c0_i32_0 : i32, i32
  }
  func.func @transform_4(%arg0: i32) -> (i32, i32) {
    %c0_i32 = arith.constant 0 : i32
    %c0_i32_0 = arith.constant 0 : i32
    %c0_i32_1 = arith.constant 0 : i32
    return %c0_i32, %c0_i32_0 : i32, i32
  }
  func.func @transform_5(%arg0: i32) -> (i32, i32) {
    %c0_i32 = arith.constant 0 : i32
    %c0_i32_0 = arith.constant 0 : i32
    %c0_i32_1 = arith.constant 0 : i32
    return %c0_i32, %c0_i32_0 : i32, i32
  }
  func.func @transform_6(%arg0: i32) -> (i32, i32) {
    %c0_i32 = arith.constant 0 : i32
    %c0_i32_0 = arith.constant 0 : i32
    %c0_i32_1 = arith.constant 0 : i32
    return %c0_i32, %c0_i32_0 : i32, i32
  }
  func.func @transform_7(%arg0: i32) -> (i32, i32) {
    %c0_i32 = arith.constant 0 : i32
    %c0_i32_0 = arith.constant 0 : i32
    return %c0_i32, %arg0 : i32, i32
  }
}

</mosaic_0001>

<bundles_post_ra>
// kernel: tpu_custom_call.1
= control target key start
LH: loop header
LB: loop body
LE: loop exit
PB: predicated region body
PF: predicated region fallthrough
CT: control target
= control target key end

     0   :  { %v657_v2 = vmov 1   ;;  %s848_s0 = inlined_call_operand.vmem [shape: bf16[2,128], index: 0, kind: input, shape index: {}]   ;;  %s849_s1 = inlined_call_operand.vmem [shape: bf16[64,2], index: 1, kind: input, shape index: {}]   ;;  %s850_s2 = inlined_call_operand.vmem [shape: bf16[64,1], index: 2, kind: input, shape index: {}]   ;;  %s851_s3 = inlined_call_operand.vmem [shape: bf16[32,64], index: 3, kind: input, shape index: {}]   ;;  %s852_s4 = inlined_call_operand.vmem [shape: f32[32,1], index: 4, kind: input, shape index: {}]   ;;  %s853_s5 = inlined_call_operand.vmem [shape: bf16[2,32], index: 5, kind: input, shape index: {}]   ;;  %s854_s6 = inlined_call_operand.vmem [shape: f32[2,1], index: 6, kind: input, shape index: {}]   ;;  %s855_s7 = inlined_call_operand.hbm [shape: f32[2,128], index: 7, kind: output, shape index: {}]  }
   0x1   :  { %v35_v0 = vld [vmem:[%s849_s1 + $0x18] sm:$0xf]  ;;  %v33_v1 = vld [vmem:[%s849_s1 + $0x10] sm:$0xf]  ;;  %625 = vset.pattern.permute.xlu0 %v657_v2  ;;  %623 = vset.pattern.permute.xlu1 %v657_v2  ;;  %v36_v3 = vld [vmem:[%s849_s1 + $0x1c] sm:$0xf] }
   0x2   :  { %219 = vperm.xlu1 %623, %v35_v0   ;;  %197 = vperm.xlu0 %625, %v33_v1   ;;  %v31_v4 = vld [vmem:[%s849_s1 + $0x8] sm:$0xf]  ;;  %v29_v5 = vld [vmem:[%s849_s1] sm:$0xf]  ;;  %v34_v6 = vld [vmem:[%s849_s1 + $0x14] sm:$0xf] }
   0x6   :  { %230 = vperm.xlu1 %623, %v36_v3   ;;  %175 = vperm.xlu0 %625, %v31_v4  }
   0x7   :  { %12 = vsyncpa [#allocation3], 0  ;;  %v658_v7 = vmov 0   ;;  %v273_v8 = vld [vmem:[%s850_s2 + $0x18] sm:$0xf]  ;;  %v393_v14 = vld [vmem:[%s852_s4 + $0x10] sm:$0xff]  ;;  %v45_v26 = vlaneseq }
   0x8   :  { %v274_v9 = vld [vmem:[%s850_s2 + $0x1c] sm:$0xf]  ;;  %v32_v10 = vld [vmem:[%s849_s1 + $0xc] sm:$0xf]  ;;  %v272_v11 = vld [vmem:[%s850_s2 + $0x14] sm:$0xf] }
   0x9   :  { %v270_v12 = vld [vmem:[%s850_s2 + $0xc] sm:$0xf]  ;;  %v271_v13 = vld [vmem:[%s850_s2 + $0x10] sm:$0xf]  ;;  %v391_v15 = vld [vmem:[%s852_s4] sm:$0xff]  ;;  %vm449_vm0 = vcmask 523264  }
   0xa   :  { %624 = vset.pattern.permute.xlu1 %v658_v7  ;;  %153 = vperm.xlu0 %625, %v29_v5   ;;  %v512_v16 = vld [vmem:[%s854_s6] sm:$0x3]  ;;  %v30_v17 = vld [vmem:[%s849_s1 + $0x4] sm:$0xf]  ;;  %v269_v18 = vld [vmem:[%s850_s2 + $0x8] sm:$0xf] }
   0xb   :  { %99 = vperm.xlu1 %624, %v34_v6   ;;  %v267_v19 = vld [vmem:[%s850_s2] sm:$0xf]  ;;  %v268_v20 = vld [vmem:[%s850_s2 + $0x4] sm:$0xf]  ;;  %v394_v21 = vld [vmem:[%s852_s4 + $0x18] sm:$0xff]  ;;  %v46_v32 = vshrl.u32 %v45_v26, 7 }
   0xc   :  { %v392_v22 = vld [vmem:[%s852_s4 + $0x8] sm:$0xff]  ;;  %v633_v23 = vld [vmem:[%s851_s3] sm:$0xff]   ;;  %v659_v30 = vmov 839922192   ;;  %vm661_vm1 = vmmov 0   ;;  %vm518_vm2 = vcmask 261120  }
   0xd   :  { %605 = vmatprep.mubr.msk.bf16.mxu0 %vm449_vm0, %v633_v23  ;;  %v28_v27 = vld [vmem:[%s848_s0] sm:$0x1]  ;;  %v43_v31 = vunpack.c.l.s4 %v659_v30  ;;  %v138_v37 = vsub.s32 0, %v46_v32  ;;  %s662_s22 = smov [#allocation2]  }
   0xe   :  { %630 = vset.pattern.permute.xlu0 %v658_v7  ;;  %v240_v33 = vshrl.u32 %v28_v27, 16  ;;  %v134_v39 = vpack.i.b16 %v28_v27, %v28_v27  ;;  %s569_s23 = sshll.u32 %s662_s22, 4  ;;  %s570_s23 = int_to_ptr.vmem [resolvable:$true] %s569_s23 }
   0xf   :  { %626 = vset.pattern.permute.xlu1 %v657_v2  ;;  %111 = vperm.xlu0 %630, %v35_v0   ;;  %v44_v36 = vunpack.c.0.s8 %v43_v31  ;;  %s635_s24 = scalar_lea.vmem %s570_s23, 32  ;;  %p640_p1 = scmp.lt.s32.totalorder %s570_s23, %s570_s23 }
  0x10   :  { %208 = vperm.xlu1 %626, %v34_v6   ;;  %v241_v38 = vpack.i.b16 %v240_v33, %v240_v33  ;;  %v139_v43 = vrot.slane %v134_v39, %v138_v37  ;;  %p636_p0 = scmp.ne.s32.totalorder %s570_s23, %s635_s24  ;;  %p641_p2 = scmp.lt.s32.totalorder %s635_s24, %s635_s24 }
  0x11   :  { %v782_v41 = vsub.s32 %v44_v36, %v46_v32 }
  0x12   :  { %v246_v42 = vrot.slane %v241_v38, %v138_v37  ;;  %v788_v49 = vcombine.low %v139_v43, %v139_v43  ;;  %p642_p3 = por %p641_p2, %p640_p1 }
  0x13   :  { %123 = vperm.xlu0 %630, %v36_v3  }
  0x14   :  { %627 = vset.pattern.permute.xlu1 %v658_v7  ;;  %v786_v48 = vcombine.low %v246_v42, %v246_v42  ;;  %p643_p4 = pnand %p642_p3, %p636_p0 }
  0x15   :  { %349 = vperm.xlu1 %627, %v273_v8  }
  0x17   :  { %87 = vperm.xlu0 %630, %v33_v1  }
  0x19   :  { %63 = vperm.xlu1 %627, %v31_v4  }
  0x1b   :  { %361 = vperm.xlu0 %630, %v274_v9  }
  0x1d   :  { %75 = vperm.xlu1 %627, %v32_v10  }
  0x1f   :  { %337 = vperm.xlu0 %630, %v272_v11  }
  0x21   :  { %628 = vset.pattern.permute.xlu1 %v657_v2 }
  0x22   :  { %186 = vperm.xlu1 %628, %v32_v10  }
  0x23   :  { %313 = vperm.xlu0 %630, %v270_v12  }
  0x26   :  { %629 = vset.pattern.permute.xlu1 %v658_v7 }
  0x27   :  { %325 = vperm.xlu1 %629, %v271_v13   ;;  %407 = vperm.xlu0 %630, %v393_v14  }
  0x2b   :  { %397 = vperm.xlu0 %630, %v391_v15   ;;  %39 = vperm.xlu1 %629, %v29_v5  }
  0x2f   :  { %515 = vperm.xlu0 %630, %v512_v16   ;;  %51 = vperm.xlu1 %629, %v30_v17  }
  0x33   :  { %631 = vset.pattern.permute.xlu1 %v657_v2 }
  0x34   :  { %164 = vperm.xlu1 %631, %v30_v17  }
  0x38   :  { %632 = vset.pattern.permute.xlu1 %v658_v7 }
  0x39   :  { %301 = vperm.xlu1 %632, %v269_v18  }
  0x3d   :  { %277 = vperm.xlu1 %632, %v267_v19  }
  0x41   :  { %289 = vperm.xlu1 %632, %v268_v20  }
  0x45   :  { %412 = vperm.xlu1 %632, %v394_v21  }
  0x49   :  { %402 = vperm.xlu1 %632, %v392_v22  }
  0x7d   :  { %v220_v24 = vpop.permute.xlu1 %219  ;;  %v198_v25 = vpop.permute.xlu0 %197 }
  0x7e   :  { %v228_v47 = vrot.slane %v220_v24, %v782_v41  ;;  %v206_v4 = vrot.slane %v198_v25, %v782_v41 }
  0x80   :  { %v257_v55 = vmul.bf16 %v786_v48, %v228_v47  ;;  %v255_v14 = vmul.bf16 %v786_v48, %v206_v4 }
  0x81   :  { %v231_v28 = vpop.permute.xlu1 %230  ;;  %v778_v29 = vpop.permute.xlu0 %175 }
  0x82   :  { %v239_v52 = vrot.slane %v231_v28, %v782_v41  ;;  %v184_v32 = vrot.slane %v778_v29, %v782_v41 }
  0x84   :  { %v258_v59 = vmul.bf16 %v786_v48, %v239_v52  ;;  %v253_v39 = vmul.bf16 %v786_v48, %v184_v32 }
  0x85   :  { %v780_v34 = vpop.permute.xlu0 %153 }
  0x86   :  { %v100_v35 = vpop.permute.xlu1 %99  ;;  %v162_v29 = vrot.slane %v780_v34, %v782_v41 }
  0x87   :  { %v108_v5 = vrot.slane %v100_v35, %v782_v41 }
  0x89   :  { %v149_v15 = vmul.bf16 %v788_v49, %v108_v5 }
  0x8a   :  { %v112_v40 = vpop.permute.xlu0 %111 }
  0x8b   :  { %v209_v44 = vpop.permute.xlu1 %208  ;;  %v120_v45 = vrot.slane %v112_v40, %v782_v41 }
  0x8c   :  { %v217_v2 = vrot.slane %v209_v44, %v782_v41 }
  0x8d   :  { %v150_v53 = vmul.bf16 %v788_v49, %v120_v45 }
  0x8e   :  { %v124_v46 = vpop.permute.xlu0 %123  ;;  %v256_v11 = vmul.bf16 %v786_v48, %v217_v2 }
  0x8f   :  { %v132_v50 = vrot.slane %v124_v46, %v782_v41  ;;  %v265_v60 = vadd.bf16 %v257_v55, %v150_v53  ;;  %v251_v55 = vmul.bf16 %v786_v48, %v162_v29 }
  0x90   :  { %v350_v51 = vpop.permute.xlu1 %349  ;;  %v264_v18 = vadd.bf16 %v256_v11, %v149_v15 }
  0x91   :  { %v151_v56 = vmul.bf16 %v788_v49, %v132_v50  ;;  %v358_v57 = vrot.slane %v350_v51, %v782_v41 }
  0x92   :  { %v88_v54 = vpop.permute.xlu0 %87 }
  0x93   :  { %v377_v62 = vadd.bf16 %v358_v57, %v265_v60  ;;  %v266_v63 = vadd.bf16 %v258_v59, %v151_v56  ;;  %v96_v6 = vrot.slane %v88_v54, %v782_v41 }
  0x94   :  { %v64_v58 = vpop.permute.xlu1 %63 }
  0x95   :  { %v385_v8 = vmax.bf16 %v658_v7, %v377_v62  ;;  %v148_v16 = vmul.bf16 %v788_v49, %v96_v6  ;;  %v72_v33 = vrot.slane %v64_v58, %v782_v41  ;;  %v660_v6 = vmov 0.0  }
  0x96   :  { %v362_v61 = vpop.permute.xlu0 %361  ;;  %609 = vmatprep.subr.bf16.mxu1 %v660_v6  ;;  %613 = vmatprep.mubr.msk.bf16.mxu1 %vm661_vm1, %v660_v6 }
  0x97   :  { %v370_v0 = vrot.slane %v362_v61, %v782_v41  ;;  %v263_v21 = vadd.bf16 %v255_v14, %v148_v16  ;;  %v146_v40 = vmul.bf16 %v788_v49, %v72_v33 }
  0x98   :  { %v76_v1 = vpop.permute.xlu1 %75 }
  0x99   :  { %v378_v3 = vadd.bf16 %v370_v0, %v266_v63  ;;  %v84_v31 = vrot.slane %v76_v1, %v782_v41  ;;  %v261_v50 = vadd.bf16 %v253_v39, %v146_v40 }
  0x9a   :  { %v338_v10 = vpop.permute.xlu0 %337 }
  0x9b   :  { %v386_v9 = vmax.bf16 %v658_v7, %v378_v3  ;;  %v346_v17 = vrot.slane %v338_v10, %v782_v41  ;;  %v147_v36 = vmul.bf16 %v788_v49, %v84_v31 }
  0x9d   :  { %v187_v12 = vpop.permute.xlu1 %186  ;;  %v584_v13 = vcombine.low %v385_v8, %v386_v9  ;;  %v376_v20 = vadd.bf16 %v346_v17, %v264_v18 }
  0x9e   :  { %v195_v27 = vrot.slane %v187_v12, %v782_v41  ;;  %v314_v38 = vpop.permute.xlu0 %313 }
  0x9f   :  { %597 = vmatprep.subr.bf16.mxu0 %v584_v13  ;;  %v384_v25 = vmax.bf16 %v658_v7, %v376_v20  ;;  %v322_v43 = vrot.slane %v314_v38, %v782_v41 }
  0xa0   :  { %598 = vmatpush3.bf16.msra.mxu0 %v584_v13  ;;  %v254_v35 = vmul.bf16 %v786_v48, %v195_v27 }
  0xa2   :  { %v326_v19 = vpop.permute.xlu1 %325  ;;  %v262_v42 = vadd.bf16 %v254_v35, %v147_v36 }
  0xa3   :  { %v334_v22 = vrot.slane %v326_v19, %v782_v41 }
  0xa4   :  { %v374_v46 = vadd.bf16 %v322_v43, %v262_v42 }
  0xa5   :  { %v375_v23 = vadd.bf16 %v334_v22, %v263_v21 }
  0xa6   :  { %v40_v24 = vpop.permute.xlu1 %39  ;;  %v382_v57 = vmax.bf16 %v658_v7, %v374_v46 }
  0xa7   :  { %v383_v26 = vmax.bf16 %v658_v7, %v375_v23  ;;  %v48_v44 = vrot.slane %v40_v24, %v782_v41  ;;  %v511_v24 = vld [vmem:[%s853_s5] sm:$0x1] }
  0xa9   :  { %v583_v28 = vcombine.low %v383_v26, %v384_v25  ;;  %v144_v52 = vmul.bf16 %v788_v49, %v48_v44 }
  0xaa   :  { %v52_v30 = vpop.permute.xlu1 %51 }
  0xab   :  { %599 = vmatprep.subr.bf16.mxu0 %v583_v28  ;;  %v60_v53 = vrot.slane %v52_v30, %v782_v41  ;;  %v259_v61 = vadd.bf16 %v251_v55, %v144_v52 }
  0xac   :  { %600 = vmatpush3.bf16.msra.mxu0 %v583_v28 }
  0xad   :  { %v145_v60 = vmul.bf16 %v788_v49, %v60_v53  ;;  %v634_v49 = vld [vmem:[%s851_s3 + $0x8] sm:$0xff]  }
  0xaf   :  { %v165_v37 = vpop.permute.xlu1 %164 }
  0xb0   :  { %v173_v47 = vrot.slane %v165_v37, %v782_v41 }
  0xb2   :  { %v252_v58 = vmul.bf16 %v786_v48, %v173_v47 }
  0xb4   :  { %v302_v45 = vpop.permute.xlu1 %301  ;;  %v260_v1 = vadd.bf16 %v252_v58, %v145_v60 }
  0xb5   :  { %v310_v51 = vrot.slane %v302_v45, %v782_v41 }
  0xb7   :  { %v373_v54 = vadd.bf16 %v310_v51, %v261_v50 }
  0xb8   :  { %v278_v56 = vpop.permute.xlu1 %277 }
  0xb9   :  { %v381_v34 = vmax.bf16 %v658_v7, %v373_v54  ;;  %v286_v59 = vrot.slane %v278_v56, %v782_v41 }
  0xbb   :  { %v582_v62 = vcombine.low %v381_v34, %v382_v57  ;;  %v371_v0 = vadd.bf16 %v286_v59, %v259_v61 }
  0xbc   :  { %v290_v63 = vpop.permute.xlu1 %289 }
  0xbd   :  { %v298_v2 = vrot.slane %v290_v63, %v782_v41  ;;  %601 = vmatprep.subr.bf16.mxu0 %v582_v62  ;;  %v379_v4 = vmax.bf16 %v658_v7, %v371_v0  ;;  %v408_v41 = vpop.permute.xlu0 %407 }
  0xbe   :  { %602 = vmatpush3.bf16.msra.mxu0 %v582_v62 }
  0xbf   :  { %v372_v3 = vadd.bf16 %v298_v2, %v260_v1 }
  0xc0   :  { %v413_v8 = vpop.permute.xlu1 %412 }
  0xc1   :  { %v380_v48 = vmax.bf16 %v658_v7, %v372_v3  ;;  %v398_v7 = vpop.permute.xlu0 %397 }
  0xc3   :  { %v581_v5 = vcombine.low %v379_v4, %v380_v48 }
  0xc4   :  { %v403_v14 = vpop.permute.xlu1 %402 }
  0xc5   :  { %603 = vmatprep.subr.bf16.mxu0 %v581_v5  ;;  %v516_v25 = vpop.permute.xlu0 %515 }
  0xc6   :  { %604 = vmatpush3.bf16.msra.mxu0 %v581_v5 }
  0xc9   :  { %606 = vmatmul.mubr.msk.bf16.vlgmr.msra.gmra.mxu0 %vm449_vm0, %v634_v49 }
 0x189   :  { %v607_v9 = vpop.f32.mrf.mxu0 }
 0x18a   :  { %v499_v11 = vadd.f32 %v607_v9, %v408_v41 }
 0x18b   :  { %v490_v10 = vpop.f32.mrf.mxu0 }
 0x18c   :  { %v507_v16 = vmax.f32 %v499_v11, 0.0  ;;  %v491_v17 = vadd.f32 %v490_v10, %v398_v7 }
 0x18d   :  { %v608_v12 = vpop.f32.mrf.mxu0 }
 0x18e   :  { %v502_v13 = vadd.f32 %v608_v12, %v413_v8  ;;  %v505_v22 = vmax.f32 %v491_v17, 0.0 }
 0x18f   :  { %v493_v15 = vpop.f32.mrf.mxu0 }
 0x190   :  { %v508_v18 = vmax.f32 %v502_v13, 0.0  ;;  %v494_v19 = vadd.f32 %v493_v15, %v403_v14 }
 0x192   :  { %v506_v20 = vmax.f32 %v494_v19, 0.0  ;;  %v510_v21 = vpack.c.bf16 %v508_v18, %v507_v16 }
 0x194   :  { %610 = vmatpush3.bf16.msra.mxu1 %v510_v21  ;;  %v509_v23 = vpack.c.bf16 %v506_v20, %v505_v22 }
 0x195   :  { %611 = vmatprep.subr.bf16.mxu1 %v660_v6 }
 0x198   :  { %612 = vmatpush3.bf16.msra.mxu1 %v509_v23 }
 0x19b   :  { %614 = vmatmul.mubr.msk.bf16.vlgmr.msra.gmra.mxu1 %vm518_vm2, %v511_v24 }
 0x25b   :  { %v556_v26 = vpop.f32.mrf.mxu1 }
 0x25c   :  { %v557_v27 = vadd.f32 %v556_v26, %v516_v25 }
 0x25d   :  { %v615_v28 = vpop.f32.mrf.mxu1 }
 0x25e   :  { %562 = vst [vmem:[#allocation2] sm:$0x3] %v557_v27 }
 0x25f   :  { %v559_v30 = vpop.f32.mrf.mxu1 }
 0x260   :  { %646 = shalt.err (!%p643_p4)
}
 0x261   :  { %572 = dma.vmem_to_hbm [thread:$0]  %s570_s23, 32, %s855_s7, [#allocation3]   ;;  %v616_v31 = vpop.f32.mrf.mxu1 }
 0x262   :  { %655 = dma.done.wait [#allocation3], 32  }
 0x263   :  { %656 = vsyncadd [#allocation3], 4294967264 }
 0x264   :  { %576 = vsyncpa [#allocation3], 1 }

</bundles_post_ra>
